<compile_context>
chip_gen: v7x
topology: tpu7x:2x2x1
jax: 0.10.0
libtpu: 0.0.40
codegen_flags: <defaults>
</compile_context>

<pallas_src>
import functools

import jax
import jax.numpy as jnp
from jax import lax
from jax.experimental import pallas as pl
from jax.experimental.pallas import tpu as pltpu


def _conf_kernel(x_ref, w1_ref, shift_ref, w2_ref, masks_ref, out_ref,
                 patches_ref, *, W):
    # x_ref      : (1, Cin, H*W)      one image, spatial flattened on lanes
    # w1_ref     : (Cmid, 9*Cpad)     3x3 conv weights (BN scale folded, Cin padded)
    # shift_ref  : (Cmid, 1)          folded BN shift
    # w2_ref     : (Cmid, 1)          1x1 conv weights
    # masks_ref  : (9, H*W)           per-tap border validity masks (1.0 / 0.0)
    # out_ref    : (1, 1, H*W)        confidence, lane-dense
    # patches_ref: (9*Cpad, H*W)      im2col scratch (VMEM)
    cin = x_ref.shape[1]
    hw = x_ref.shape[2]
    cpad = patches_ref.shape[0] // 9

    x = x_ref[0]                                   # (Cin, HW) f32

    # Zero the im2col scratch so the channel-pad rows contribute nothing
    # (re-done every grid step: correct under megacore grid partitioning).
    patches_ref[...] = jnp.zeros_like(patches_ref)

    # Build the im2col patch matrix: each tap is a lane rotation (XLU) of the
    # flattened image, multiplied by its precomputed border mask (VPU), and
    # stored at a sublane-aligned offset (no relayout copies).
    k = 0
    for dy in (-1, 0, 1):
        for dx in (-1, 0, 1):
            s = dy * W + dx                        # source offset in flat index
            shifted = x if s == 0 else pltpu.roll(x, (-s) % hw, 1)
            shifted = shifted * masks_ref[k:k + 1, :]     # zero out-of-image taps
            patches_ref[k * cpad:k * cpad + cin, :] = shifted
            k += 1

    # 3x3 conv (+ folded BN scale) as one MXU matmul, f32 accumulation:
    # (Cmid, 9*Cpad) @ (9*Cpad, HW) -> (Cmid, HW).
    y = jnp.dot(w1_ref[...], patches_ref[...],
                preferred_element_type=jnp.float32)
    # Folded BN shift + ReLU (VPU, lane-broadcast of per-channel values).
    y = jnp.maximum(y + shift_ref[...], 0.0)
    # 1x1 conv to a single confidence channel: per-sublane scale + sublane sum.
    o = jnp.sum(y * w2_ref[...], axis=0, keepdims=True)      # (1, HW)
    out_ref[0] = o.astype(out_ref.dtype)


def confidence_estimation(cost_nchw, w1_oihw, bn_gamma, bn_beta,
                          bn_mean, bn_var, w2_oihw, eps=1e-5):
    """cost_nchw: (N, Cin, H, W) float32 (PyTorch layout).  Returns (N, 1, H, W)."""
    N, Cin, H, W = cost_nchw.shape
    Cmid = w1_oihw.shape[0]
    HW = H * W
    Cpad = ((Cin + 7) // 8) * 8        # sublane-aligned per-tap stride in im2col K

    # ---- glue (plain JAX, no activation transpose/pad HBM round-trips) ----
    # Free row-major reshape: NCHW -> (N, Cin, H*W), spatial on lanes.
    x = cost_nchw.reshape(N, Cin, HW).astype(jnp.float32)

    # Eval-mode BN fold: scale into the 3x3 weights, shift stays as a bias.
    scale = bn_gamma / jnp.sqrt(bn_var + eps)                         # (Cmid,)
    shift = (bn_beta - bn_mean * scale).reshape(Cmid, 1).astype(jnp.float32)

    # (Cmid, Cin, 3, 3) -> (Cmid, 3, 3, Cin), fold scale, pad Cin -> (Cmid, 9*Cpad)
    w1 = jnp.transpose(w1_oihw, (0, 2, 3, 1)) * scale[:, None, None, None]
    w1 = jnp.pad(w1, ((0, 0), (0, 0), (0, 0), (0, Cpad - Cin)))
    w1 = w1.reshape(Cmid, 9 * Cpad).astype(jnp.float32)

    w2 = w2_oihw.reshape(Cmid, 1).astype(jnp.float32)                 # (Cmid, 1)

    # Per-tap border validity masks (1.0 inside the image, 0.0 outside) — tiny
    # constant (9*HW floats) built once, consumed broadcast on sublanes.
    hh = jnp.arange(HW, dtype=jnp.int32) // W
    ww = jnp.arange(HW, dtype=jnp.int32) % W
    mask_rows = []
    for dy in (-1, 0, 1):
        for dx in (-1, 0, 1):
            valid = ((hh + dy >= 0) & (hh + dy < H) &
                     (ww + dx >= 0) & (ww + dx < W))
            mask_rows.append(valid.astype(jnp.float32))
    tap_masks = jnp.stack(mask_rows, axis=0)                          # (9, HW)

    flops = 2 * N * HW * (9 * Cin * Cmid + Cmid)
    bytes_accessed = 4 * (N * Cin * HW + Cmid * 9 * Cpad + 2 * Cmid
                          + 9 * HW + N * HW)

    # ---- Pallas kernel: grid over batch (parallel -> both TCs on v7x) ----
    out = pl.pallas_call(
        functools.partial(_conf_kernel, W=W),
        out_shape=jax.ShapeDtypeStruct((N, 1, HW), jnp.float32),
        grid_spec=pltpu.PrefetchScalarGridSpec(
            num_scalar_prefetch=0,
            grid=(N,),
            in_specs=[
                pl.BlockSpec((1, Cin, HW), lambda n: (n, 0, 0)),
                pl.BlockSpec((Cmid, 9 * Cpad), lambda n: (0, 0)),
                pl.BlockSpec((Cmid, 1), lambda n: (0, 0)),
                pl.BlockSpec((Cmid, 1), lambda n: (0, 0)),
                pl.BlockSpec((9, HW), lambda n: (0, 0)),
            ],
            out_specs=pl.BlockSpec((1, 1, HW), lambda n: (n, 0, 0)),
            scratch_shapes=[pltpu.VMEM((9 * Cpad, HW), jnp.float32)],
        ),
        compiler_params=pltpu.CompilerParams(
            dimension_semantics=("parallel",)),
        cost_estimate=pl.CostEstimate(
            flops=flops, transcendentals=0, bytes_accessed=bytes_accessed),
    )(x, w1, shift, w2, tap_masks)

    # Free reshape back to the PyTorch output layout.
    return out.reshape(N, 1, H, W)


def _reference(cost_nchw, w1_oihw, bn_gamma, bn_beta, bn_mean, bn_var,
               w2_oihw, eps=1e-5):
    """Plain-JAX reference of the same forward pass (for a sanity check)."""
    y = lax.conv_general_dilated(
        cost_nchw, w1_oihw, window_strides=(1, 1), padding=((1, 1), (1, 1)),
        dimension_numbers=("NCHW", "OIHW", "NCHW"))
    scale = (bn_gamma / jnp.sqrt(bn_var + eps)).reshape(1, -1, 1, 1)
    shift = (bn_beta - bn_mean * bn_gamma / jnp.sqrt(bn_var + eps)).reshape(1, -1, 1, 1)
    y = jnp.maximum(y * scale + shift, 0.0)
    return lax.conv_general_dilated(
        y, w2_oihw, window_strides=(1, 1), padding=((0, 0), (0, 0)),
        dimension_numbers=("NCHW", "OIHW", "NCHW"))


if __name__ == "__main__":
    N, Cin, H, W = 2, 12, 16, 16
    Cmid = max(Cin // 3, 1)

    key = jax.random.PRNGKey(0)
    k_x, k_w1, k_w2, k_g, k_b, k_m, k_v = jax.random.split(key, 7)

    cost = jax.random.normal(k_x, (N, Cin, H, W), dtype=jnp.float32)
    # Conv weights in PyTorch OIHW layout, deterministic init
    w1 = jax.random.normal(k_w1, (Cmid, Cin, 3, 3), dtype=jnp.float32) * 0.1
    w2 = jax.random.normal(k_w2, (1, Cmid, 1, 1), dtype=jnp.float32) * 0.1
    # BatchNorm (eval-mode) parameters / running stats
    bn_gamma = jax.random.uniform(k_g, (Cmid,), minval=0.5, maxval=1.5)
    bn_beta = jax.random.normal(k_b, (Cmid,)) * 0.1
    bn_mean = jax.random.normal(k_m, (Cmid,)) * 0.1
    bn_var = jax.random.uniform(k_v, (Cmid,), minval=0.5, maxval=1.5)

    out = confidence_estimation(cost, w1, bn_gamma, bn_beta, bn_mean, bn_var, w2)
    out = jax.block_until_ready(out)

    ref = _reference(cost, w1, bn_gamma, bn_beta, bn_mean, bn_var, w2)
    assert out.shape == (N, 1, H, W)
    assert jnp.allclose(out, ref, rtol=1e-4, atol=1e-4)

    print("KERNEL_OK")
</pallas_src>

<mosaic_0001>
module attributes {stable_mosaic.version = 11 : i64} {
  func.func @_conf_kernel(%arg0: i32, %arg1: memref<1x12x256xf32, #tpu.memory_space<vmem>>, %arg2: memref<4x144xf32, #tpu.memory_space<vmem>>, %arg3: memref<4x1xf32, #tpu.memory_space<vmem>>, %arg4: memref<4x1xf32, #tpu.memory_space<vmem>>, %arg5: memref<9x256xf32, #tpu.memory_space<vmem>>, %arg6: memref<1x1x256xf32, #tpu.memory_space<vmem>>, %arg7: memref<144x256xf32, #tpu.memory_space<vmem>>) attributes {dimension_semantics = [#tpu.dimension_semantics<parallel>], iteration_bounds = array<i64: 2>, scalar_prefetch = 0 : i64, scratch_operands = 1 : i64, tpu.core_type = #tpu.core_type<tc>, window_params = [{transform_indices = @transform_0, window_bounds = array<i64: 1, 12, 256>}, {pipeline_mode = #tpu.pipeline_mode<synchronous>, transform_indices = @transform_1, window_bounds = array<i64: 4, 144>}, {pipeline_mode = #tpu.pipeline_mode<synchronous>, transform_indices = @transform_2, window_bounds = array<i64: 4, 1>}, {pipeline_mode = #tpu.pipeline_mode<synchronous>, transform_indices = @transform_3, window_bounds = array<i64: 4, 1>}, {pipeline_mode = #tpu.pipeline_mode<synchronous>, transform_indices = @transform_4, window_bounds = array<i64: 9, 256>}, {transform_indices = @transform_5, window_bounds = array<i64: 1, 1, 256>}]} {
    %c0 = arith.constant 0 : index
    %c0_0 = arith.constant 0 : index
    %c0_1 = arith.constant 0 : index
    %0 = vector.load %arg1[%c0, %c0_0, %c0_1] : memref<1x12x256xf32, #tpu.memory_space<vmem>>, vector<1x12x256xf32>
    %1 = vector.shape_cast %0 : vector<1x12x256xf32> to vector<12x256xf32>
    %cst = arith.constant 0.000000e+00 : f32
    %2 = vector.broadcast %cst : f32 to vector<144x256xf32>
    %c0_2 = arith.constant 0 : index
    %c0_3 = arith.constant 0 : index
    %3 = vector.load %arg7[%c0_2, %c0_3] : memref<144x256xf32, #tpu.memory_space<vmem>>, vector<144x256xf32>
    tpu.vector_store %arg7[%c0_2, %c0_3], %2 {strides = array<i32>} : memref<144x256xf32, #tpu.memory_space<vmem>>, vector<144x256xf32>,
    %c17_i32 = arith.constant 17 : i32
    %4 = tpu.dynamic_rotate %1 by %c17_i32 dim 1 : vector<12x256xf32>, i32 -> vector<12x256xf32>
    %c0_4 = arith.constant 0 : index
    %c0_5 = arith.constant 0 : index
    %5 = vector.load %arg5[%c0_4, %c0_5] : memref<9x256xf32, #tpu.memory_space<vmem>>, vector<1x256xf32>
    %6 = vector.broadcast %5 : vector<1x256xf32> to vector<12x256xf32>
    %7 = arith.mulf %4, %6 : vector<12x256xf32>
    %c0_6 = arith.constant 0 : index
    %c0_7 = arith.constant 0 : index
    %8 = vector.load %arg7[%c0_6, %c0_7] : memref<144x256xf32, #tpu.memory_space<vmem>>, vector<12x256xf32>
    tpu.vector_store %arg7[%c0_6, %c0_7], %7 {strides = array<i32>} : memref<144x256xf32, #tpu.memory_space<vmem>>, vector<12x256xf32>,
    %c16_i32 = arith.constant 16 : i32
    %9 = tpu.dynamic_rotate %1 by %c16_i32 dim 1 : vector<12x256xf32>, i32 -> vector<12x256xf32>
    %c1 = arith.constant 1 : index
    %c0_8 = arith.constant 0 : index
    %10 = vector.load %arg5[%c1, %c0_8] : memref<9x256xf32, #tpu.memory_space<vmem>>, vector<1x256xf32>
    %11 = vector.broadcast %10 : vector<1x256xf32> to vector<12x256xf32>
    %12 = arith.mulf %9, %11 : vector<12x256xf32>
    %c16 = arith.constant 16 : index
    %c0_9 = arith.constant 0 : index
    %13 = vector.load %arg7[%c16, %c0_9] : memref<144x256xf32, #tpu.memory_space<vmem>>, vector<12x256xf32>
    tpu.vector_store %arg7[%c16, %c0_9], %12 {strides = array<i32>} : memref<144x256xf32, #tpu.memory_space<vmem>>, vector<12x256xf32>,
    %c15_i32 = arith.constant 15 : i32
    %14 = tpu.dynamic_rotate %1 by %c15_i32 dim 1 : vector<12x256xf32>, i32 -> vector<12x256xf32>
    %c2 = arith.constant 2 : index
    %c0_10 = arith.constant 0 : index
    %15 = vector.load %arg5[%c2, %c0_10] : memref<9x256xf32, #tpu.memory_space<vmem>>, vector<1x256xf32>
    %16 = vector.broadcast %15 : vector<1x256xf32> to vector<12x256xf32>
    %17 = arith.mulf %14, %16 : vector<12x256xf32>
    %c32 = arith.constant 32 : index
    %c0_11 = arith.constant 0 : index
    %18 = vector.load %arg7[%c32, %c0_11] : memref<144x256xf32, #tpu.memory_space<vmem>>, vector<12x256xf32>
    tpu.vector_store %arg7[%c32, %c0_11], %17 {strides = array<i32>} : memref<144x256xf32, #tpu.memory_space<vmem>>, vector<12x256xf32>,
    %c1_i32 = arith.constant 1 : i32
    %19 = tpu.dynamic_rotate %1 by %c1_i32 dim 1 : vector<12x256xf32>, i32 -> vector<12x256xf32>
    %c3 = arith.constant 3 : index
    %c0_12 = arith.constant 0 : index
    %20 = vector.load %arg5[%c3, %c0_12] : memref<9x256xf32, #tpu.memory_space<vmem>>, vector<1x256xf32>
    %21 = vector.broadcast %20 : vector<1x256xf32> to vector<12x256xf32>
    %22 = arith.mulf %19, %21 : vector<12x256xf32>
    %c48 = arith.constant 48 : index
    %c0_13 = arith.constant 0 : index
    %23 = vector.load %arg7[%c48, %c0_13] : memref<144x256xf32, #tpu.memory_space<vmem>>, vector<12x256xf32>
    tpu.vector_store %arg7[%c48, %c0_13], %22 {strides = array<i32>} : memref<144x256xf32, #tpu.memory_space<vmem>>, vector<12x256xf32>,
    %c4 = arith.constant 4 : index
    %c0_14 = arith.constant 0 : index
    %24 = vector.load %arg5[%c4, %c0_14] : memref<9x256xf32, #tpu.memory_space<vmem>>, vector<1x256xf32>
    %25 = vector.broadcast %24 : vector<1x256xf32> to vector<12x256xf32>
    %26 = arith.mulf %1, %25 : vector<12x256xf32>
    %c64 = arith.constant 64 : index
    %c0_15 = arith.constant 0 : index
    %27 = vector.load %arg7[%c64, %c0_15] : memref<144x256xf32, #tpu.memory_space<vmem>>, vector<12x256xf32>
    tpu.vector_store %arg7[%c64, %c0_15], %26 {strides = array<i32>} : memref<144x256xf32, #tpu.memory_space<vmem>>, vector<12x256xf32>,
    %c255_i32 = arith.constant 255 : i32
    %28 = tpu.dynamic_rotate %1 by %c255_i32 dim 1 : vector<12x256xf32>, i32 -> vector<12x256xf32>
    %c5 = arith.constant 5 : index
    %c0_16 = arith.constant 0 : index
    %29 = vector.load %arg5[%c5, %c0_16] : memref<9x256xf32, #tpu.memory_space<vmem>>, vector<1x256xf32>
    %30 = vector.broadcast %29 : vector<1x256xf32> to vector<12x256xf32>
    %31 = arith.mulf %28, %30 : vector<12x256xf32>
    %c80 = arith.constant 80 : index
    %c0_17 = arith.constant 0 : index
    %32 = vector.load %arg7[%c80, %c0_17] : memref<144x256xf32, #tpu.memory_space<vmem>>, vector<12x256xf32>
    tpu.vector_store %arg7[%c80, %c0_17], %31 {strides = array<i32>} : memref<144x256xf32, #tpu.memory_space<vmem>>, vector<12x256xf32>,
    %c241_i32 = arith.constant 241 : i32
    %33 = tpu.dynamic_rotate %1 by %c241_i32 dim 1 : vector<12x256xf32>, i32 -> vector<12x256xf32>
    %c6 = arith.constant 6 : index
    %c0_18 = arith.constant 0 : index
    %34 = vector.load %arg5[%c6, %c0_18] : memref<9x256xf32, #tpu.memory_space<vmem>>, vector<1x256xf32>
    %35 = vector.broadcast %34 : vector<1x256xf32> to vector<12x256xf32>
    %36 = arith.mulf %33, %35 : vector<12x256xf32>
    %c96 = arith.constant 96 : index
    %c0_19 = arith.constant 0 : index
    %37 = vector.load %arg7[%c96, %c0_19] : memref<144x256xf32, #tpu.memory_space<vmem>>, vector<12x256xf32>
    tpu.vector_store %arg7[%c96, %c0_19], %36 {strides = array<i32>} : memref<144x256xf32, #tpu.memory_space<vmem>>, vector<12x256xf32>,
    %c240_i32 = arith.constant 240 : i32
    %38 = tpu.dynamic_rotate %1 by %c240_i32 dim 1 : vector<12x256xf32>, i32 -> vector<12x256xf32>
    %c7 = arith.constant 7 : index
    %c0_20 = arith.constant 0 : index
    %39 = vector.load %arg5[%c7, %c0_20] : memref<9x256xf32, #tpu.memory_space<vmem>>, vector<1x256xf32>
    %40 = vector.broadcast %39 : vector<1x256xf32> to vector<12x256xf32>
    %41 = arith.mulf %38, %40 : vector<12x256xf32>
    %c112 = arith.constant 112 : index
    %c0_21 = arith.constant 0 : index
    %42 = vector.load %arg7[%c112, %c0_21] : memref<144x256xf32, #tpu.memory_space<vmem>>, vector<12x256xf32>
    tpu.vector_store %arg7[%c112, %c0_21], %41 {strides = array<i32>} : memref<144x256xf32, #tpu.memory_space<vmem>>, vector<12x256xf32>,
    %c239_i32 = arith.constant 239 : i32
    %43 = tpu.dynamic_rotate %1 by %c239_i32 dim 1 : vector<12x256xf32>, i32 -> vector<12x256xf32>
    %c8 = arith.constant 8 : index
    %c0_22 = arith.constant 0 : index
    %44 = vector.load %arg5[%c8, %c0_22] : memref<9x256xf32, #tpu.memory_space<vmem>>, vector<1x256xf32>
    %45 = vector.broadcast %44 : vector<1x256xf32> to vector<12x256xf32>
    %46 = arith.mulf %43, %45 : vector<12x256xf32>
    %c128 = arith.constant 128 : index
    %c0_23 = arith.constant 0 : index
    %47 = vector.load %arg7[%c128, %c0_23] : memref<144x256xf32, #tpu.memory_space<vmem>>, vector<12x256xf32>
    tpu.vector_store %arg7[%c128, %c0_23], %46 {strides = array<i32>} : memref<144x256xf32, #tpu.memory_space<vmem>>, vector<12x256xf32>,
    %c0_24 = arith.constant 0 : index
    %c0_25 = arith.constant 0 : index
    %48 = vector.load %arg2[%c0_24, %c0_25] : memref<4x144xf32, #tpu.memory_space<vmem>>, vector<4x144xf32>
    %c0_26 = arith.constant 0 : index
    %c0_27 = arith.constant 0 : index
    %49 = vector.load %arg7[%c0_26, %c0_27] : memref<144x256xf32, #tpu.memory_space<vmem>>, vector<144x256xf32>
    %cst_28 = arith.constant dense<0.000000e+00> : vector<4x256xf32>
    %50 = tpu.matmul %48, %49, %cst_28 {dimension_numbers = #tpu.dot_dimension_numbers<[1], [0], [0], [1], [0, 0, 1, 1], [], []>} : vector<4x144xf32>, vector<144x256xf32>, vector<4x256xf32> -> vector<4x256xf32>
    %c0_29 = arith.constant 0 : index
    %c0_30 = arith.constant 0 : index
    %51 = vector.load %arg3[%c0_29, %c0_30] : memref<4x1xf32, #tpu.memory_space<vmem>>, vector<4x1xf32>
    %52 = vector.broadcast %51 : vector<4x1xf32> to vector<4x256xf32>
    %53 = arith.addf %50, %52 : vector<4x256xf32>
    %cst_31 = arith.constant 0.000000e+00 : f32
    %54 = vector.broadcast %cst_31 : f32 to vector<4x256xf32>
    %55 = arith.maximumf %53, %54 : vector<4x256xf32>
    %c0_32 = arith.constant 0 : index
    %c0_33 = arith.constant 0 : index
    %56 = vector.load %arg4[%c0_32, %c0_33] : memref<4x1xf32, #tpu.memory_space<vmem>>, vector<4x1xf32>
    %57 = vector.broadcast %56 : vector<4x1xf32> to vector<4x256xf32>
    %58 = arith.mulf %55, %57 : vector<4x256xf32>
    %cst_34 = arith.constant dense<0.000000e+00> : vector<256xf32>
    %59 = vector.multi_reduction <add>, %58, %cst_34 [0] : vector<4x256xf32> to vector<256xf32>
    %60 = vector.shape_cast %59 : vector<256xf32> to vector<1x256xf32>
    %c0_35 = arith.constant 0 : index
    %c0_36 = arith.constant 0 : index
    %c0_37 = arith.constant 0 : index
    %61 = vector.load %arg6[%c0_35, %c0_36, %c0_37] : memref<1x1x256xf32, #tpu.memory_space<vmem>>, vector<1x1x256xf32>
    %62 = vector.shape_cast %61 : vector<1x1x256xf32> to vector<1x256xf32>
    %63 = vector.shape_cast %60 : vector<1x256xf32> to vector<1x1x256xf32>
    tpu.vector_store %arg6[%c0_35, %c0_36, %c0_37], %63 {strides = array<i32>} : memref<1x1x256xf32, #tpu.memory_space<vmem>>, vector<1x1x256xf32>,
    return
  }
  func.func @transform_0(%arg0: i32) -> (i32, i32, i32) {
    %c0_i32 = arith.constant 0 : i32
    %c0_i32_0 = arith.constant 0 : i32
    %c0_i32_1 = arith.constant 0 : i32
    return %arg0, %c0_i32, %c0_i32_0 : i32, i32, i32
  }
  func.func @transform_1(%arg0: i32) -> (i32, i32) {
    %c0_i32 = arith.constant 0 : i32
    %c0_i32_0 = arith.constant 0 : i32
    %c0_i32_1 = arith.constant 0 : i32
    return %c0_i32, %c0_i32_0 : i32, i32
  }
  func.func @transform_2(%arg0: i32) -> (i32, i32) {
    %c0_i32 = arith.constant 0 : i32
    %c0_i32_0 = arith.constant 0 : i32
    %c0_i32_1 = arith.constant 0 : i32
    return %c0_i32, %c0_i32_0 : i32, i32
  }
  func.func @transform_3(%arg0: i32) -> (i32, i32) {
    %c0_i32 = arith.constant 0 : i32
    %c0_i32_0 = arith.constant 0 : i32
    %c0_i32_1 = arith.constant 0 : i32
    return %c0_i32, %c0_i32_0 : i32, i32
  }
  func.func @transform_4(%arg0: i32) -> (i32, i32) {
    %c0_i32 = arith.constant 0 : i32
    %c0_i32_0 = arith.constant 0 : i32
    %c0_i32_1 = arith.constant 0 : i32
    return %c0_i32, %c0_i32_0 : i32, i32
  }
  func.func @transform_5(%arg0: i32) -> (i32, i32, i32) {
    %c0_i32 = arith.constant 0 : i32
    %c0_i32_0 = arith.constant 0 : i32
    %c0_i32_1 = arith.constant 0 : i32
    return %arg0, %c0_i32, %c0_i32_0 : i32, i32, i32
  }
}

</mosaic_0001>

<bundles_post_ra>
// kernel: tpu_custom_call.1
= control target key start
LH: loop header
LB: loop body
LE: loop exit
PB: predicated region body
PF: predicated region fallthrough
CT: control target
= control target key end

     0   :  { %10 = vsyncpa [#allocation4], 0  ;;  %s1205_s0 = inlined_call_operand.vmem [shape: f32[2,12,256], index: 0, kind: input, shape index: {}]   ;;  %s1206_s1 = inlined_call_operand.vmem [shape: f32[4,144], index: 1, kind: input, shape index: {}]   ;;  %s1207_s2 = inlined_call_operand.vmem [shape: f32[4,1], index: 2, kind: input, shape index: {}]   ;;  %s1208_s3 = inlined_call_operand.vmem [shape: f32[4,1], index: 3, kind: input, shape index: {}]   ;;  %s1209_s4 = inlined_call_operand.vmem [shape: f32[9,256], index: 4, kind: input, shape index: {}]   ;;  %s1210_s5 = inlined_call_operand.hbm [shape: f32[2,1,256], index: 5, kind: output, shape index: {}]  }
   0x1   :  { %12 = vsyncpa [#allocation4 + $0x1], 0  ;;  %s1016_s18 = smov 0   ;;  %s1018_s19 = smov 0  }
   0x2   :  { %s1020_s20 = smov 0   ;;  %s1022_s21 = smov 0  }
   0x3 LB: > { %s1037_s22 = sadd.s32 4294967295, %s972_s21   ;;  %s798_s23 = sadd.s32 4294967294, %s972_s21   ;;  %s972_s21 = sphi %s1022_s21, %s1216_s21   ;;  %s968_s20 = sphi %s1020_s20, %s1215_s20   ;;  %s964_s19 = sphi %s1018_s19, %s1214_s19   ;;  %s960_s18 = sphi %s1016_s18, %s1213_s18  }
   0x4   : > { %s1041_s24 = sadd.s32 1, %s972_s21   ;;  %s135_s25 = sadd.s32 1, %s968_s20 }
   0x5   : > { %s132_s26 = ssub.s32 %s972_s21, %s1041_s24  ;;  %p145_p0 = scmp.ne.s32.totalorder %s968_s20, %s964_s19 }
   0x6   : > { %p133_p1 = scmp.eq.s32.totalorder %s132_s26, 0  ;;  %p146_p2 = scmp.eq.s32.totalorder %s1037_s22, 1 }
   0x7   : > { %p151_p3 = scmp.ne.s32.totalorder %s964_s19, %s960_s18  ;;  %p152_p4 = scmp.eq.s32.totalorder %s798_s23, 1 }
   0x8   : > { %s1052_s27 = scalar_select %p133_p1, %s968_s20, %s135_s25  }
   0x9   : > { %p1054_p5 = por %p146_p2, %p145_p0  ;;  %p1058_p6 = por %p152_p4, %p151_p3 }
   0xa   : > { %p801_p7 = scmp.ge.s32.totalorder %s972_s21, 1  ;;  %p190_p8 = scmp.lt.s32.totalorder %s972_s21, 3 }
   0xc   : > { %p191_p9 = pnand %p801_p7, %p190_p8 }
   0xd   : > { %p218_p10 = scmp.lt.s32.totalorder (!%p191_p9), %s1037_s22, 1  ;;  %v974_v0 = vmov (!%p191_p9), 0.0   ;;  %s975_s10 = smov (!%p191_p9), 17   ;;  %v271_v5 = vlaneseq (!%p191_p9)  ;;  %v808_v9 = vld [vmem:[%s1209_s4 + $0x4] ss:$8 sm:$0x3] (!%p191_p9) }
   0xe   : > { %194 = sbr.rel (%p191_p9) target bundleno = 470 (0x1d6), region = 40  ;;  %229 = vst [vmem:[#allocation2 + $0x10] sm:$0xff] (!%p191_p9), %v974_v0  ;;  %230 = vst [vmem:[#allocation2 + $0x18] sm:$0xff] (!%p191_p9), %v974_v0  ;;  %s976_s11 = smov (!%p191_p9), 16   ;;  %v1092_v16 = vld [vmem:[%s1206_s1] sm:$0xff] (!%p191_p9)  ;;  %vm602_vm0 = vcmask (!%p191_p9), 130048  }
   0xf   : > { %233 = vst [vmem:[#allocation2 + $0x30] sm:$0xff] (!%p191_p9), %v974_v0  ;;  %234 = vst [vmem:[#allocation2 + $0x38] sm:$0xff] (!%p191_p9), %v974_v0  ;;  %v1072_v6 = vshrl.u32 (!%p191_p9), %v271_v5, 7  ;;  %s977_s12 = smov (!%p191_p9), 15   ;;  %s978_s15 = smov (!%p191_p9), 1   ;;  %v601_v17 = vcombine.high (!%p191_p9), %v1092_v16, %v1092_v16  ;;  %v983_v20 = vmov (!%p191_p9), 0  }
  0x10   : > { %237 = vst [vmem:[#allocation2 + $0x50] sm:$0xff] (!%p191_p9), %v974_v0  ;;  %238 = vst [vmem:[#allocation2 + $0x58] sm:$0xff] (!%p191_p9), %v974_v0  ;;  %s979_s16 = smov (!%p191_p9), 127   ;;  %s980_s17 = smov (!%p191_p9), 113   ;;  %v594_v18 = vld [vmem:[%s1207_s2] sm:$0xf] (!%p191_p9)  ;;  %907 = vset.pattern.permute.xlu0 (!%p191_p9), %v983_v20  ;;  %908 = vset.pattern.permute.xlu1 (!%p191_p9), %v983_v20 }
  0x11   : > { %241 = vst [vmem:[#allocation2 + $0x70] sm:$0xff] (!%p191_p9), %v974_v0  ;;  %242 = vst [vmem:[#allocation2 + $0x78] sm:$0xff] (!%p191_p9), %v974_v0  ;;  %v1075_v7 = vsub.s32 (!%p191_p9), 1, %v1072_v6  ;;  %v1078_v8 = vsub.s32 (!%p191_p9), 0, %v1072_v6  ;;  %s981_s23 = smov (!%p191_p9), 112   ;;  %s982_s25 = smov (!%p191_p9), 111   ;;  %813 = vmatprep.mubr.msk.f32.mxu0 (!%p191_p9), %vm602_vm0, %v601_v17 }
  0x12   : > { %245 = vst [vmem:[#allocation2 + $0x90] sm:$0xff] (!%p191_p9), %v974_v0  ;;  %246 = vst [vmem:[#allocation2 + $0x98] sm:$0xff] (!%p191_p9), %v974_v0  ;;  %v678_v19 = vld [vmem:[%s1208_s3] sm:$0xf] (!%p191_p9)  ;;  %v1103_v21 = vand.u32 (!%p191_p9), 127, %v271_v5  ;;  %vm686_vm9 = vcmask (!%p191_p9), 1043456  }
  0x13   : > { %249 = vst [vmem:[#allocation2 + $0xb0] sm:$0xff] (!%p191_p9), %v974_v0  ;;  %250 = vst [vmem:[#allocation2 + $0xb8] sm:$0xff] (!%p191_p9), %v974_v0  ;;  %v410_v10 = vrot.slane (!%p191_p9), %v808_v9, %v1075_v7  ;;  %v406_v11 = vrot.slane (!%p191_p9), %v808_v9, %v1078_v8  ;;  %v278_v22 = vld [vmem:[%s1209_s4] ss:$8 sm:$0x3] (!%p191_p9)  ;;  %vm721_vm10 = vcmp.lt.s32.totalorder (!%p191_p9), %v271_v5, 256 }
  0x14   : > { %253 = vst [vmem:[#allocation2 + $0xd0] sm:$0xff] (!%p191_p9), %v974_v0  ;;  %254 = vst [vmem:[#allocation2 + $0xd8] sm:$0xff] (!%p191_p9), %v974_v0  ;;  %vm273_vm1 = vcmp.lt.s32.totalorder (!%p191_p9), %v1103_v21, 17  ;;  %v283_v23 = vrot.slane (!%p191_p9), %v278_v22, %v1078_v8  ;;  %v287_v24 = vrot.slane (!%p191_p9), %v278_v22, %v1075_v7  ;;  %v805_v37 = vld [vmem:[%s1209_s4 + $0x1] ss:$8 sm:$0x3] (!%p191_p9) }
  0x15   : > { %257 = vst [vmem:[#allocation2 + $0xf0] sm:$0xff] %v974_v0  ;;  %258 = vst [vmem:[#allocation2 + $0xf8] sm:$0xff] %v974_v0  ;;  %s219_s30 = scalar_select %p218_p10, %s1037_s22, 1  ;;  %vm306_vm2 = vcmp.lt.s32.totalorder %v1103_v21, 16  ;;  %v317_v40 = vrot.slane %v805_v37, %v1078_v8  ;;  %v321_v41 = vrot.slane %v805_v37, %v1075_v7  ;;  %vm340_vm3 = vcmp.lt.s32.totalorder %v1103_v21, 15 }
  0x16   : > { %261 = vst [vmem:[#allocation2 + $0x110] sm:$0xff] %v974_v0  ;;  %262 = vst [vmem:[#allocation2 + $0x118] sm:$0xff] %v974_v0  ;;  %v806_v54 = vld [vmem:[%s1209_s4 + $0x2] ss:$8 sm:$0x3]  ;;  %vm374_vm4 = vcmp.lt.s32.totalorder %v1103_v21, 1 }
  0x17   : > { %s819_s6 = sshll.u32 %s219_s30, 5  ;;  %v351_v59 = vrot.slane %v806_v54, %v1078_v8  ;;  %v355_v60 = vrot.slane %v806_v54, %v1075_v7  ;;  %vm429_vm5 = vcmp.lt.s32.totalorder %v1103_v21, 127  ;;  %vm463_vm6 = vcmp.lt.s32.totalorder %v1103_v21, 113 }
  0x18   : > { %s222_s9 = scalar_lea.vmem %s1205_s0, %s819_s6  ;;  %vm497_vm7 = vcmp.lt.s32.totalorder %v1103_v21, 112  ;;  %vm531_vm8 = vcmp.lt.s32.totalorder %v1103_v21, 111 }
  0x19   : > { %v224_v1 = vld [vmem:[%s222_s9 + $0x8] sm:$0xff]  ;;  %v223_v2 = vld [vmem:[%s222_s9] sm:$0xff]  ;;  %v226_v3 = vld [vmem:[%s222_s9 + $0x18] sm:$0xf] }
  0x1a   : > { %267 = vrot.lane.b32.xlu1 %v224_v1, %s975_s10  ;;  %263 = vrot.lane.b32.xlu0 %v223_v2, %s975_s10  ;;  %v225_v4 = vld [vmem:[%s222_s9 + $0x10] sm:$0xf]  ;;  %v416_v12 = vmul.f32 %v410_v10, %v226_v3  ;;  %v1085_v14 = vmul.f32 %v410_v10, %v224_v1  ;;  %v1087_v15 = vmul.f32 %v406_v11, %v223_v2 }
  0x1b   : > { %v415_v13 = vmul.f32 %v406_v11, %v225_v4 }
  0x1c   : > { %420 = vst [vmem:[#allocation2 + $0x98] sm:$0xf] %v416_v12 }
  0x1d   : > { %419 = vst [vmem:[#allocation2 + $0x90] sm:$0xf] %v415_v13  ;;  %v807_v13 = vld [vmem:[%s1209_s4 + $0x3] ss:$8 sm:$0x3] }
  0x1e   : > { %269 = vrot.lane.b32.xlu1 %v226_v3, %s975_s10  ;;  %265 = vrot.lane.b32.xlu0 %v225_v4, %s975_s10  ;;  %v385_v22 = vrot.slane %v807_v13, %v1078_v8  ;;  %s215_s10 = sand.u32 1, %s964_s19  }
  0x22   : > { %300 = vrot.lane.b32.xlu1 %v225_v4, %s976_s11  ;;  %298 = vrot.lane.b32.xlu0 %v223_v2, %s976_s11 }
  0x26   : > { %304 = vrot.lane.b32.xlu1 %v226_v3, %s976_s11  ;;  %302 = vrot.lane.b32.xlu0 %v224_v1, %s976_s11  ;;  %s802_s11 = sshll.u32 %s215_s10, 1 }
  0x27   : > { %s217_s13 = scalar_lea.vmem [#allocation3], %s802_s11 }
  0x28   : > { %s739_s14 = sshll.u32 %s217_s13, 4  ;;  %s1165_s14 = int_to_ptr.vmem [resolvable:$true] %s739_s14 }
  0x2a   : > { %334 = vrot.lane.b32.xlu1 %v225_v4, %s977_s12  ;;  %332 = vrot.lane.b32.xlu0 %v223_v2, %s977_s12 }
  0x2e   : > { %338 = vrot.lane.b32.xlu1 %v226_v3, %s977_s12  ;;  %336 = vrot.lane.b32.xlu0 %v224_v1, %s977_s12  ;;  %s820_s12 = sshll.u32 %s1037_s22, 5  ;;  %s985_s22 = smov [#allocation3]  }
  0x2f   : > { %s914_s26 = sshll.u32 %s985_s22, 4  ;;  %s915_s26 = int_to_ptr.vmem [resolvable:$false] %s914_s26 }
  0x30   : > { %s916_s30 = scalar_lea.vmem %s915_s26, 64  ;;  %p917_p0 = scmp.lt.s32.totalorder %s1165_s14, %s915_s26 }
  0x32   : > { %368 = vrot.lane.b32.xlu1 %v225_v4, %s978_s15  ;;  %366 = vrot.lane.b32.xlu0 %v223_v2, %s978_s15 }
  0x36   : > { %372 = vrot.lane.b32.xlu1 %v226_v3, %s978_s15  ;;  %370 = vrot.lane.b32.xlu0 %v224_v1, %s978_s15 }
  0x3a   : > { %423 = vrot.lane.b32.xlu1 %v225_v4, %s979_s16  ;;  %421 = vrot.lane.b32.xlu0 %v223_v2, %s979_s16 }
  0x3e   : > { %427 = vrot.lane.b32.xlu1 %v226_v3, %s979_s16  ;;  %425 = vrot.lane.b32.xlu0 %v224_v1, %s979_s16 }
  0x42   : > { %457 = vrot.lane.b32.xlu1 %v225_v4, %s980_s17  ;;  %455 = vrot.lane.b32.xlu0 %v223_v2, %s980_s17 }
  0x46   : > { %461 = vrot.lane.b32.xlu1 %v226_v3, %s980_s17  ;;  %459 = vrot.lane.b32.xlu0 %v224_v1, %s980_s17  ;;  %s1163_s17 = scalar_lea.hbm %s1210_s5, %s820_s12 }
  0x4a   : > { %491 = vrot.lane.b32.xlu1 %v225_v4, %s981_s23  ;;  %489 = vrot.lane.b32.xlu0 %v223_v2, %s981_s23 }
  0x4e   : > { %495 = vrot.lane.b32.xlu1 %v226_v3, %s981_s23  ;;  %493 = vrot.lane.b32.xlu0 %v224_v1, %s981_s23  ;;  %s725_s23 = scalar_lea.sflag [#allocation4], %s215_s10 }
  0x52   : > { %525 = vrot.lane.b32.xlu1 %v225_v4, %s982_s25  ;;  %523 = vrot.lane.b32.xlu0 %v223_v2, %s982_s25 }
  0x56   : > { %529 = vrot.lane.b32.xlu1 %v226_v3, %s982_s25  ;;  %527 = vrot.lane.b32.xlu0 %v224_v1, %s982_s25  ;;  %s910_s25 = scalar_lea.vmem %s1165_s14, 32 }
  0x57   : > { %p911_p11 = scmp.ne.s32.totalorder %s1165_s14, %s910_s25  ;;  %p918_p1 = scmp.lt.s32.totalorder %s916_s30, %s910_s25 }
  0x59   : > { %p912_p12 = pnand %p911_p11, %p1054_p5  ;;  %p919_p2 = por %p918_p1, %p917_p0 }
  0x5a   : > { %597 = vperm.xlu0 %907, %v594_v18   ;;  %681 = vperm.xlu1 %908, %v678_v19  }
  0x5b   : > { %p913_p13 = pneg %p912_p12 }
  0x5d   : > { %p920_p3 = pnand %p919_p2, %p913_p13 }
  0x8c   : > { %v268_v25 = vpop.permute.xlu1 %267  ;;  %v264_v26 = vpop.permute.xlu0 %263 }
  0x8d   : > { %v274_v27 = vsel %vm273_vm1, %v264_v26, %v268_v25  ;;  %v276_v28 = vsel %vm273_vm1, %v268_v25, %v264_v26 }
  0x8e   : > { %v290_v29 = vmul.f32 %v283_v23, %v276_v28  ;;  %v291_v30 = vmul.f32 %v287_v24, %v274_v27 }
  0x90   : > { %v270_v31 = vpop.permute.xlu1 %269  ;;  %v266_v32 = vpop.permute.xlu0 %265 }
  0x91   : > { %v275_v33 = vsel %vm273_vm1, %v266_v32, %v270_v31  ;;  %v277_v34 = vsel %vm273_vm1, %v270_v31, %v266_v32 }
  0x92   : > { %v292_v35 = vmul.f32 %v283_v23, %v277_v34  ;;  %v293_v36 = vmul.f32 %v287_v24, %v275_v33  ;;  %v389_v23 = vrot.slane %v807_v13, %v1075_v7 }
  0x94   : > { %296 = vst [vmem:[#allocation2 + $0x10] sm:$0xf] %v292_v35  ;;  %297 = vst [vmem:[#allocation2 + $0x18] sm:$0xf] %v293_v36  ;;  %v301_v38 = vpop.permute.xlu1 %300  ;;  %v299_v39 = vpop.permute.xlu0 %298 }
  0x95   : > { %v809_v36 = vld [vmem:[%s1209_s4 + $0x5] ss:$8 sm:$0x3] }
  0x98   : > { %v305_v42 = vpop.permute.xlu1 %304  ;;  %v303_v43 = vpop.permute.xlu0 %302 }
  0x99   : > { %v308_v44 = vsel %vm306_vm2, %v301_v38, %v305_v42  ;;  %v310_v45 = vsel %vm306_vm2, %v305_v42, %v301_v38  ;;  %v307_v46 = vsel %vm306_vm2, %v299_v39, %v303_v43  ;;  %v309_v47 = vsel %vm306_vm2, %v303_v43, %v299_v39 }
  0x9a   : > { %v326_v48 = vmul.f32 %v317_v40, %v310_v45  ;;  %v327_v49 = vmul.f32 %v321_v41, %v308_v44  ;;  %v324_v50 = vmul.f32 %v317_v40, %v309_v47  ;;  %v325_v51 = vmul.f32 %v321_v41, %v307_v46 }
  0x9b   : > { %v561_v52 = vld [vmem:[#allocation2 + $0x18] sm:$0xff]  ;;  %v560_v53 = vld [vmem:[#allocation2 + $0x10] sm:$0xff]  ;;  %v440_v41 = vrot.slane %v809_v36, %v1078_v8  ;;  %v444_v42 = vrot.slane %v809_v36, %v1075_v7 }
  0x9c   : > { %330 = vst [vmem:[#allocation2 + $0x30] sm:$0xf] %v326_v48  ;;  %331 = vst [vmem:[#allocation2 + $0x38] sm:$0xf] %v327_v49  ;;  %v335_v55 = vpop.permute.xlu1 %334  ;;  %v333_v56 = vpop.permute.xlu0 %332  ;;  %v821_v57 = vpack.c.bf16 %v561_v52, %v291_v30  ;;  %v823_v58 = vpack.c.bf16 %v560_v53, %v290_v29  ;;  %v577_v49 = vld [vmem:[#allocation2 + $0x98] sm:$0xff] }
  0x9e   : > { %822 = vmatprep.subr.bf16.mxu0 %v821_v57 }
  0x9f   : > { %824 = vmatpush1.bf16.msra.mxu0 %v823_v58 }
  0xa0   : > { %v339_v61 = vpop.permute.xlu1 %338  ;;  %v337_v62 = vpop.permute.xlu0 %336 }
  0xa1   : > { %v342_v63 = vsel %vm340_vm3, %v335_v55, %v339_v61  ;;  %v344_v0 = vsel %vm340_vm3, %v339_v61, %v335_v55  ;;  %v341_v1 = vsel %vm340_vm3, %v333_v56, %v337_v62  ;;  %v343_v2 = vsel %vm340_vm3, %v337_v62, %v333_v56  ;;  %v810_v56 = vld [vmem:[%s1209_s4 + $0x6] ss:$8 sm:$0x3]  ;;  %v576_v62 = vld [vmem:[#allocation2 + $0x90] sm:$0xff] }
  0xa2   : > { %v360_v3 = vmul.f32 %v351_v59, %v344_v0  ;;  %v361_v4 = vmul.f32 %v355_v60, %v342_v63  ;;  %v358_v9 = vmul.f32 %v351_v59, %v343_v2  ;;  %v359_v10 = vmul.f32 %v355_v60, %v341_v1 }
  0xa3   : > { %v565_v11 = vld [vmem:[#allocation2 + $0x38] sm:$0xff]  ;;  %v564_v12 = vld [vmem:[#allocation2 + $0x30] sm:$0xff]  ;;  %v837_v61 = vpack.c.bf16 %v577_v49, %v1085_v14  ;;  %v474_v63 = vrot.slane %v810_v56, %v1078_v8  ;;  %v478_v0 = vrot.slane %v810_v56, %v1075_v7  ;;  %v839_v1 = vpack.c.bf16 %v576_v62, %v1087_v15 }
  0xa4   : > { %364 = vst [vmem:[#allocation2 + $0x50] sm:$0xf] %v360_v3  ;;  %365 = vst [vmem:[#allocation2 + $0x58] sm:$0xf] %v361_v4  ;;  %v369_v17 = vpop.permute.xlu1 %368  ;;  %v367_v18 = vpop.permute.xlu0 %366  ;;  %v825_v19 = vpack.c.bf16 %v565_v11, %v325_v51  ;;  %v827_v20 = vpack.c.bf16 %v564_v12, %v324_v50 }
  0xa6   : > { %826 = vmatprep.subr.bf16.mxu0 %v825_v19 }
  0xa7   : > { %828 = vmatpush1.bf16.msra.mxu0 %v827_v20  ;;  %v811_v20 = vld [vmem:[%s1209_s4 + $0x7] ss:$8 sm:$0x3] }
  0xa8   : > { %v373_v24 = vpop.permute.xlu1 %372  ;;  %v371_v25 = vpop.permute.xlu0 %370 }
  0xa9   : > { %v376_v26 = vsel %vm374_vm4, %v369_v17, %v373_v24  ;;  %v378_v27 = vsel %vm374_vm4, %v373_v24, %v369_v17  ;;  %v375_v28 = vsel %vm374_vm4, %v367_v18, %v371_v25  ;;  %v377_v29 = vsel %vm374_vm4, %v371_v25, %v367_v18 }
  0xaa   : > { %v394_v30 = vmul.f32 %v385_v22, %v378_v27  ;;  %v395_v31 = vmul.f32 %v389_v23, %v376_v26  ;;  %v392_v32 = vmul.f32 %v385_v22, %v377_v29  ;;  %v393_v33 = vmul.f32 %v389_v23, %v375_v28 }
  0xab   : > { %v569_v34 = vld [vmem:[#allocation2 + $0x58] sm:$0xff]  ;;  %v568_v35 = vld [vmem:[#allocation2 + $0x50] sm:$0xff]  ;;  %v508_v25 = vrot.slane %v811_v20, %v1078_v8  ;;  %v512_v26 = vrot.slane %v811_v20, %v1075_v7 }
  0xac   : > { %398 = vst [vmem:[#allocation2 + $0x70] sm:$0xf] %v394_v30  ;;  %399 = vst [vmem:[#allocation2 + $0x78] sm:$0xf] %v395_v31  ;;  %v424_v37 = vpop.permute.xlu1 %423  ;;  %v422_v38 = vpop.permute.xlu0 %421  ;;  %v829_v39 = vpack.c.bf16 %v569_v34, %v359_v10  ;;  %v831_v40 = vpack.c.bf16 %v568_v35, %v358_v9 }
  0xae   : > { %830 = vmatprep.subr.bf16.mxu0 %v829_v39  ;;  %v812_v39 = vld [vmem:[%s1209_s4 + $0x10] ss:$8 sm:$0x3] }
  0xaf   : > { %832 = vmatpush1.bf16.msra.mxu0 %v831_v40 }
  0xb0   : > { %v428_v43 = vpop.permute.xlu1 %427  ;;  %v426_v44 = vpop.permute.xlu0 %425 }
  0xb1   : > { %v431_v45 = vsel %vm429_vm5, %v424_v37, %v428_v43  ;;  %v433_v46 = vsel %vm429_vm5, %v428_v43, %v424_v37  ;;  %v430_v47 = vsel %vm429_vm5, %v422_v38, %v426_v44  ;;  %v432_v48 = vsel %vm429_vm5, %v426_v44, %v422_v38 }
  0xb2   : > { %v449_v50 = vmul.f32 %v440_v41, %v431_v45  ;;  %v450_v51 = vmul.f32 %v444_v42, %v433_v46  ;;  %v447_v52 = vmul.f32 %v440_v41, %v430_v47  ;;  %v448_v53 = vmul.f32 %v444_v42, %v432_v48 }
  0xb3   : > { %v573_v54 = vld [vmem:[#allocation2 + $0x78] sm:$0xff]  ;;  %v572_v55 = vld [vmem:[#allocation2 + $0x70] sm:$0xff]  ;;  %v542_v44 = vrot.slane %v812_v39, %v1078_v8  ;;  %v546_v45 = vrot.slane %v812_v39, %v1075_v7 }
  0xb4   : > { %453 = vst [vmem:[#allocation2 + $0xb0] sm:$0xf] %v449_v50  ;;  %454 = vst [vmem:[#allocation2 + $0xb8] sm:$0xf] %v450_v51  ;;  %v458_v57 = vpop.permute.xlu1 %457  ;;  %v456_v58 = vpop.permute.xlu0 %455  ;;  %v833_v59 = vpack.c.bf16 %v573_v54, %v393_v33  ;;  %v835_v60 = vpack.c.bf16 %v572_v55, %v392_v32 }
  0xb6   : > { %834 = vmatprep.subr.bf16.mxu0 %v833_v59 }
  0xb7   : > { %836 = vmatpush1.bf16.msra.mxu0 %v835_v60 }
  0xb8   : > { %v462_v2 = vpop.permute.xlu1 %461  ;;  %v460_v3 = vpop.permute.xlu0 %459  ;;  %838 = vmatprep.subr.bf16.mxu0 %v837_v61 }
  0xb9   : > { %v465_v4 = vsel %vm463_vm6, %v458_v57, %v462_v2  ;;  %v467_v9 = vsel %vm463_vm6, %v462_v2, %v458_v57  ;;  %v464_v10 = vsel %vm463_vm6, %v456_v58, %v460_v3  ;;  %v466_v11 = vsel %vm463_vm6, %v460_v3, %v456_v58 }
  0xba   : > { %v483_v12 = vmul.f32 %v474_v63, %v465_v4  ;;  %v484_v14 = vmul.f32 %v478_v0, %v467_v9  ;;  %v481_v13 = vmul.f32 %v474_v63, %v464_v10  ;;  %v482_v17 = vmul.f32 %v478_v0, %v466_v11 }
  0xbb   : > { %840 = vmatpush1.bf16.msra.mxu0 %v839_v1  ;;  %v581_v18 = vld [vmem:[#allocation2 + $0xb8] sm:$0xff]  ;;  %v580_v19 = vld [vmem:[#allocation2 + $0xb0] sm:$0xff] }
  0xbc   : > { %487 = vst [vmem:[#allocation2 + $0xd0] sm:$0xf] %v483_v12  ;;  %488 = vst [vmem:[#allocation2 + $0xd8] sm:$0xf] %v484_v14  ;;  %v492_v15 = vpop.permute.xlu1 %491  ;;  %v490_v22 = vpop.permute.xlu0 %489  ;;  %v841_v23 = vpack.c.bf16 %v581_v18, %v448_v53  ;;  %v843_v24 = vpack.c.bf16 %v580_v19, %v447_v52 }
  0xbe   : > { %842 = vmatprep.subr.bf16.mxu0 %v841_v23 }
  0xbf   : > { %844 = vmatpush1.bf16.msra.mxu0 %v843_v24 }
  0xc0   : > { %v496_v27 = vpop.permute.xlu1 %495  ;;  %v494_v28 = vpop.permute.xlu0 %493 }
  0xc1   : > { %v499_v29 = vsel %vm497_vm7, %v492_v15, %v496_v27  ;;  %v501_v30 = vsel %vm497_vm7, %v496_v27, %v492_v15  ;;  %v498_v31 = vsel %vm497_vm7, %v490_v22, %v494_v28  ;;  %v500_v32 = vsel %vm497_vm7, %v494_v28, %v490_v22 }
  0xc2   : > { %v517_v33 = vmul.f32 %v508_v25, %v499_v29  ;;  %v518_v34 = vmul.f32 %v512_v26, %v501_v30  ;;  %v515_v35 = vmul.f32 %v508_v25, %v498_v31  ;;  %v516_v36 = vmul.f32 %v512_v26, %v500_v32 }
  0xc3   : > { %v585_v37 = vld [vmem:[#allocation2 + $0xd8] sm:$0xff]  ;;  %v584_v38 = vld [vmem:[#allocation2 + $0xd0] sm:$0xff] }
  0xc4   : > { %521 = vst [vmem:[#allocation2 + $0xf0] sm:$0xf] %v517_v33  ;;  %522 = vst [vmem:[#allocation2 + $0xf8] sm:$0xf] %v518_v34  ;;  %v526_v40 = vpop.permute.xlu1 %525  ;;  %v524_v41 = vpop.permute.xlu0 %523  ;;  %v845_v42 = vpack.c.bf16 %v585_v37, %v482_v17  ;;  %v847_v43 = vpack.c.bf16 %v584_v38, %v481_v13 }
  0xc6   : > { %846 = vmatprep.subr.bf16.mxu0 %v845_v42 }
  0xc7   : > { %848 = vmatpush1.bf16.msra.mxu0 %v847_v43 }
  0xc8   : > { %v530_v46 = vpop.permute.xlu1 %529  ;;  %v528_v47 = vpop.permute.xlu0 %527 }
  0xc9   : > { %v533_v48 = vsel %vm531_vm8, %v526_v40, %v530_v46  ;;  %v535_v49 = vsel %vm531_vm8, %v530_v46, %v526_v40  ;;  %v532_v50 = vsel %vm531_vm8, %v524_v41, %v528_v47  ;;  %v534_v51 = vsel %vm531_vm8, %v528_v47, %v524_v41 }
  0xca   : > { %v551_v52 = vmul.f32 %v542_v44, %v533_v48  ;;  %v552_v53 = vmul.f32 %v546_v45, %v535_v49  ;;  %v549_v54 = vmul.f32 %v542_v44, %v532_v50  ;;  %v550_v55 = vmul.f32 %v546_v45, %v534_v51 }
  0xcb   : > { %v589_v56 = vld [vmem:[#allocation2 + $0xf8] sm:$0xff]  ;;  %v588_v57 = vld [vmem:[#allocation2 + $0xf0] sm:$0xff] }
  0xcc   : > { %555 = vst [vmem:[#allocation2 + $0x110] sm:$0xf] %v551_v52  ;;  %556 = vst [vmem:[#allocation2 + $0x118] sm:$0xf] %v552_v53  ;;  %v849_v21 = vpack.c.bf16 %v589_v56, %v516_v36  ;;  %v851_v58 = vpack.c.bf16 %v588_v57, %v515_v35 }
  0xce   : > { %850 = vmatprep.subr.bf16.mxu0 %v849_v21 }
  0xcf   : > { %852 = vmatpush1.bf16.msra.mxu0 %v851_v58 }
  0xd3   : > { %v593_v7 = vld [vmem:[#allocation2 + $0x118] sm:$0xff]  ;;  %v592_v8 = vld [vmem:[#allocation2 + $0x110] sm:$0xff] }
  0xd4   : > { %v853_v59 = vpack.c.bf16 %v593_v7, %v550_v55  ;;  %v855_v60 = vpack.c.bf16 %v592_v8, %v549_v54 }
  0xd6   : > { %854 = vmatprep.subr.bf16.mxu0 %v853_v59 }
  0xd7   : > { %856 = vmatpush1.bf16.msra.mxu0 %v855_v60 }
  0xd9   : > { %v598_v61 = vpop.permute.xlu0 %597  ;;  %v682_v2 = vpop.permute.xlu1 %681 }
  0xda   : > { %670 = vmatmul.mubr.f32.vlgmr.msra.gmra.mrb[0].mxu0 %v1092_v16  ;;  %v984_v16 = vmov 1966171168  }
  0xdb   : > { %v705_v19 = vunpack.c.l.s4 %v984_v16 }
  0xdd   : > { %v706_v24 = vunpack.c.0.s8 %v705_v19 }
  0xdf   : > { %v709_v29 = vsub.s32 %v706_v24, %v1072_v6 }
 0x1ad   : > { %v671_v62 = vpop.f32.mrb[0].mxu0 }
 0x1ae   : > { %v672_v63 = vadd.f32 %v671_v62, %v598_v61  ;;  %v673_v0 = vpop.f32.mrb[1].mxu0 }
 0x1af   : > { %v674_v1 = vadd.f32 %v673_v0, %v598_v61 }
 0x1b0   : > { %v676_v3 = vmax.f32 %v672_v63, 0.0 }
 0x1b1   : > { %v677_v4 = vmax.f32 %v674_v1, 0.0 }
 0x1b2   : > { %v684_v9 = vmul.f32 %v682_v2, %v676_v3 }
 0x1b3   : > { %v685_v10 = vmul.f32 %v682_v2, %v677_v4 }
 0x1b4   : > { %v687_v11 = vsel %vm686_vm9, %v684_v9, 0.0 }
 0x1b5   : > { %v688_v12 = vrot.slane %v687_v11, 4  ;;  %v694_v14 = vsel %vm686_vm9, %v685_v10, 0.0 }
 0x1b6   : > { %v695_v13 = vrot.slane %v694_v14, 4 }
 0x1b7   : > { %v689_v17 = vadd.f32 %v688_v12, %v687_v11 }
 0x1b8   : > { %v696_v18 = vadd.f32 %v695_v13, %v694_v14 }
 0x1b9   : > { %v690_v20 = vrot.slane %v689_v17, 2 }
 0x1ba   : > { %v697_v15 = vrot.slane %v696_v18, 2 }
 0x1bb   : > { %v691_v22 = vadd.f32 %v690_v20, %v689_v17 }
 0x1bc   : > { %v698_v23 = vadd.f32 %v697_v15, %v696_v18 }
 0x1bd   : > { %v692_v25 = vrot.slane %v691_v22, 1 }
 0x1be   : > { %v699_v26 = vrot.slane %v698_v23, 1 }
 0x1bf   : > { %v693_v27 = vadd.f32 %v692_v25, %v691_v22 }
 0x1c0   : > { %v700_v28 = vadd.f32 %v699_v26, %v698_v23 }
 0x1c2   : > { %v703_v30 = vcombine.low %v693_v27, %v700_v28 }
 0x1c4   : > { %v710_v31 = vrot.slane %v703_v30, %v709_v29 }
 0x1c6   : > { %v717_v32 = vrot.slane %v710_v31, %v709_v29 }
 0x1c8   : > { %723 = vst.msk [vmem:[%s217_s13] sm:$0x3] %vm721_vm10, %v717_v32 }
 0x1c9   : > { %923 = shalt.err (!%p920_p3)
}
 0x1ca   : > { %s924_s6 = scalar_lea.hbm %s1163_s17, 32  ;;  %s928_s9 = scalar_lea.hbm %s1210_s5, 64 }
 0x1cb   : > { %p925_p4 = scmp.ne.s32.totalorder %s1163_s17, %s924_s6  ;;  %p929_p9 = scmp.lt.u32.totalorder %s1163_s17, %s1210_s5 }
 0x1cc   : > { %p930_p10 = scmp.lt.u32.totalorder %s928_s9, %s924_s6  ;;  %p932_p12 = scmp.lt.u32.totalorder %s924_s6, %s1163_s17 }
 0x1cd   : > { %p926_p7 = pnand %p925_p4, %p1054_p5 }
 0x1ce   : > { %p931_p11 = por %p930_p10, %p929_p9 }
 0x1cf   : > { %p927_p8 = pneg %p926_p7 }
 0x1d0   : > { %p933_p13 = por %p932_p12, %p931_p11 }
 0x1d2   : > { %p934_p0 = pnand %p933_p13, %p927_p8 }
 0x1d4   : > { %937 = shalt.err (!%p934_p0)
}
 0x1d5   : > { %857 = dma.vmem_to_hbm [thread:$0]  (%p1054_p5), %s1165_s14, 32, %s1163_s17, %s725_s23  }
 0x1d6 PF: > { %p863_p1 = scmp.ge.s32.totalorder %s972_s21, 2  ;;  %s751_s12 = sand.u32 1, %s960_s18  }
 0x1d7   : > { %s752_s13 = scalar_lea.sflag [#allocation4], %s751_s12 }
 0x1d8   : > { %p860_p2 = pnand %p863_p1, %p1058_p6 }
 0x1da   : > { %955 = dma.done.wait (!%p860_p2), %s752_s13, 32  }
 0x1db   : > { %957 = vsyncadd (!%p860_p2), %s752_s13, 4294967264  ;;  %p15_p3 = scmp.ge.s32.totalorder %s1041_s24, 4   ;;  %s1213_s18 = smov %s964_s19 }
 0x1dc   : > { %s1214_s19 = smov %s968_s20  ;;  %s1215_s20 = smov %s1052_s27 }
 0x1dd   : > { %s1216_s21 = smov %s1041_s24  ;;  %17 = sbr.rel (!%p15_p3) target bundleno = 3 (0x3), region = 83 }
 0x1e4   :  { %757 = vsyncpa [#allocation4], 1 }
 0x1e5   :  { %759 = vsyncpa [#allocation4 + $0x1], 1 }

</bundles_post_ra>
